<compile_context>
chip_gen: v5e
topology: v5e:2x2
jax: 0.10.0
libtpu: 0.0.40
codegen_flags: <defaults>
</compile_context>

<pallas_src>
import functools

import jax
import jax.numpy as jnp
from jax.experimental import pallas as pl
from jax.experimental.pallas import tpu as pltpu


# ---------------------------------------------------------------------------
# Pallas kernel
# ---------------------------------------------------------------------------
def _attention_gate_kernel(g_ref, x_ref, wg_ref, wx_ref, bgx_ref,
                           wpsi_ref, bpsi_ref, out_ref):
    # g_ref : (F_g, TP)  bf16      x_ref : (F_l, TP)  bf16
    # wg_ref: (F_int, F_g) bf16    wx_ref: (F_int, F_l) bf16
    # bgx_ref: (F_int, 1) f32  (bg_eff + bx_eff, BN folded)
    # wpsi_ref: (F_int, 1) f32     bpsi_ref: (1, 1) f32
    g1 = jnp.dot(wg_ref[...], g_ref[...], preferred_element_type=jnp.float32)
    x1 = jnp.dot(wx_ref[...], x_ref[...], preferred_element_type=jnp.float32)

    a = jnp.maximum(g1 + x1 + bgx_ref[...], 0.0)          # (F_int, TP) f32

    # psi projection: F_int is tiny -> VPU multiply + sublane reduce (XLU),
    # avoids an MXU pass that would produce a single (masked) output column.
    psi_lin = jnp.sum(a * wpsi_ref[...], axis=0, keepdims=True) + bpsi_ref[...]
    # sigmoid via exp (EUP) + approximate reciprocal (EUP) -> VALU stays free.
    psi = pl.reciprocal(1.0 + jnp.exp(-psi_lin), approx=True)   # (1, TP)

    out_ref[...] = (x_ref[...].astype(jnp.float32) * psi).astype(out_ref.dtype)


# ---------------------------------------------------------------------------
# Parameter container / deterministic init
# ---------------------------------------------------------------------------
def init_attention_gate_params(key, F_g, F_l, F_int, dtype=jnp.float32):
    """Deterministic synthetic parameters (conv weights/biases + BN stats)."""
    ks = jax.random.split(key, 12)

    def conv_w(k, cin, cout):
        # kernel_size=1 conv weight, stored as (cin, cout) matmul weight
        return (jax.random.normal(k, (cin, cout), dtype) * 0.1).astype(dtype)

    def bn(k_gamma, k_beta, k_mean, k_var, c):
        gamma = 1.0 + 0.1 * jax.random.normal(k_gamma, (c,), dtype)
        beta = 0.1 * jax.random.normal(k_beta, (c,), dtype)
        mean = 0.1 * jax.random.normal(k_mean, (c,), dtype)
        var = 0.5 + jax.random.uniform(k_var, (c,), dtype)   # positive
        return gamma, beta, mean, var

    params = {
        "Wg": conv_w(ks[0], F_g, F_int),
        "bg": 0.1 * jax.random.normal(ks[1], (F_int,), dtype),
        "bn_g": bn(ks[2], ks[3], ks[4], ks[5], F_int),
        "Wx": conv_w(ks[6], F_l, F_int),
        "bx": 0.1 * jax.random.normal(ks[7], (F_int,), dtype),
        "bn_x": bn(ks[8], ks[9], ks[10], ks[11], F_int),
    }
    ks2 = jax.random.split(jax.random.fold_in(key, 1), 6)
    params["Wpsi"] = conv_w(ks2[0], F_int, 1)
    params["bpsi"] = 0.1 * jax.random.normal(ks2[1], (1,), dtype)
    params["bn_psi"] = bn(ks2[2], ks2[3], ks2[4], ks2[5], 1)
    return params


def _fuse_conv_bn(W, b, bn_params, eps=1e-5):
    """Fold inference-mode BatchNorm into a 1x1 conv (matmul) weight/bias."""
    gamma, beta, mean, var = bn_params
    scale = gamma / jnp.sqrt(var + eps)          # (C_out,)
    W_eff = W * scale[None, :]                   # (C_in, C_out)
    b_eff = (b - mean) * scale + beta            # (C_out,)
    return W_eff, b_eff


# ---------------------------------------------------------------------------
# Wrapper: NCHW kept as-is, only reshaped to (N, C, H*W) (free), pallas_call
# ---------------------------------------------------------------------------
@functools.partial(jax.jit, static_argnames=("tile_p_max",))
def attention_gate_forward(params, g, x, tile_p_max=1024):
    """g: (N, F_g, H, W), x: (N, F_l, H, W)  ->  (N, F_l, H, W)  (NCHW, f32)."""
    N, F_g, H, W = g.shape
    _, F_l, _, _ = x.shape
    F_int = params["Wg"].shape[1]
    HW = H * W

    # NCHW -> (N, C, H*W): pure reshape, no transpose, no extra HBM pass.
    # bf16 for the streamed operands halves HBM read traffic (bandwidth-bound).
    g3 = g.reshape(N, F_g, HW).astype(jnp.bfloat16)
    x3 = x.reshape(N, F_l, HW).astype(jnp.bfloat16)

    # Fold BatchNorm (eval mode) into the 1x1 convs; orient weights as
    # (C_out, C_in) so the kernel matmul produces a lane-dense (C_out, TP).
    Wg_eff, bg_eff = _fuse_conv_bn(params["Wg"], params["bg"], params["bn_g"])
    Wx_eff, bx_eff = _fuse_conv_bn(params["Wx"], params["bx"], params["bn_x"])
    Wpsi_eff, bpsi_eff = _fuse_conv_bn(params["Wpsi"], params["bpsi"],
                                       params["bn_psi"])

    WgT = jnp.transpose(Wg_eff).astype(jnp.bfloat16)          # (F_int, F_g)
    WxT = jnp.transpose(Wx_eff).astype(jnp.bfloat16)          # (F_int, F_l)
    b_gx = (bg_eff + bx_eff).reshape(F_int, 1).astype(jnp.float32)
    wpsi = Wpsi_eff.reshape(F_int, 1).astype(jnp.float32)
    bpsi = bpsi_eff.reshape(1, 1).astype(jnp.float32)

    # Pixel tile: as large as reasonable (multiple of 128), or the full H*W
    # when the image is small (full-dim blocks are always legal, no padding).
    if HW >= tile_p_max:
        tile_p = tile_p_max            # multiple of 128; tail block masked
    else:
        tile_p = HW                    # single full-extent block per batch

    grid = (N, pl.cdiv(HW, tile_p))

    # VMEM budget (double-buffered): 2*(F_g + F_l)*tile_p*2B (bf16 inputs)
    # + 2*F_l*tile_p*4B (f32 output) + tiny weights — a few MiB even for
    # realistic UNet channel counts; 32 MiB covers v5e's 16 MiB scoped default
    # and stays safely inside v7x's 64 MiB VMEM.
    out3 = pl.pallas_call(
        _attention_gate_kernel,
        out_shape=jax.ShapeDtypeStruct((N, F_l, HW), jnp.float32),
        grid_spec=pltpu.PrefetchScalarGridSpec(
            num_scalar_prefetch=0,
            grid=grid,
            in_specs=[
                pl.BlockSpec((None, F_g, tile_p), lambda b, i: (b, 0, i)),  # g
                pl.BlockSpec((None, F_l, tile_p), lambda b, i: (b, 0, i)),  # x
                pl.BlockSpec((F_int, F_g), lambda b, i: (0, 0)),   # WgT
                pl.BlockSpec((F_int, F_l), lambda b, i: (0, 0)),   # WxT
                pl.BlockSpec((F_int, 1), lambda b, i: (0, 0)),     # b_gx
                pl.BlockSpec((F_int, 1), lambda b, i: (0, 0)),     # wpsi
                pl.BlockSpec((1, 1), lambda b, i: (0, 0)),         # bpsi
            ],
            out_specs=pl.BlockSpec((None, F_l, tile_p),
                                   lambda b, i: (b, 0, i)),
        ),
        compiler_params=pltpu.CompilerParams(
            dimension_semantics=("parallel", "parallel"),
            vmem_limit_bytes=32 * 1024 * 1024),
    )(g3, x3, WgT, WxT, b_gx, wpsi, bpsi)

    return out3.reshape(N, F_l, H, W)


# ---------------------------------------------------------------------------
# Pure-JAX reference (same math, f32 end-to-end, no Pallas) for verification
# ---------------------------------------------------------------------------
def attention_gate_reference(params, g, x):
    N, F_g, H, W = g.shape
    _, F_l, _, _ = x.shape
    g_flat = jnp.transpose(g, (0, 2, 3, 1)).reshape(-1, F_g)
    x_flat = jnp.transpose(x, (0, 2, 3, 1)).reshape(-1, F_l)

    Wg_eff, bg_eff = _fuse_conv_bn(params["Wg"], params["bg"], params["bn_g"])
    Wx_eff, bx_eff = _fuse_conv_bn(params["Wx"], params["bx"], params["bn_x"])
    Wpsi_eff, bpsi_eff = _fuse_conv_bn(params["Wpsi"], params["bpsi"],
                                       params["bn_psi"])

    g1 = g_flat @ Wg_eff + bg_eff
    x1 = x_flat @ Wx_eff + bx_eff
    a = jnp.maximum(g1 + x1, 0.0)
    psi = jax.nn.sigmoid(a @ Wpsi_eff + bpsi_eff)
    out = x_flat * psi
    return jnp.transpose(out.reshape(N, H, W, F_l), (0, 3, 1, 2))


# ---------------------------------------------------------------------------
if __name__ == "__main__":
    key = jax.random.PRNGKey(0)
    k_param, k_g, k_x = jax.random.split(key, 3)

    # small shapes: batch=2, F_g=F_l=4 channels, F_int=8, spatial 16x16
    N, F_g, F_l, F_int, H, W = 2, 4, 4, 8, 16, 16

    params = init_attention_gate_params(k_param, F_g, F_l, F_int)
    g = jax.random.normal(k_g, (N, F_g, H, W), jnp.float32)
    x = jax.random.normal(k_x, (N, F_l, H, W), jnp.float32)

    out = attention_gate_forward(params, g, x)
    out = jax.block_until_ready(out)

    ref = attention_gate_reference(params, g, x)
    assert out.shape == (N, F_l, H, W)
    # bf16 streaming of g/x/weights (f32 accumulation) -> loosened tolerance
    # vs. the all-f32 reference.
    assert jnp.allclose(out, ref, atol=3e-2, rtol=3e-2), "mismatch vs reference"

    print("KERNEL_OK")
</pallas_src>

<mosaic_0001>
module attributes {stable_mosaic.version = 11 : i64} {
  func.func @_attention_gate_kernel(%arg0: i32, %arg1: i32, %arg2: memref<1x4x256xbf16, #tpu.memory_space<vmem>>, %arg3: memref<1x4x256xbf16, #tpu.memory_space<vmem>>, %arg4: memref<8x4xbf16, #tpu.memory_space<vmem>>, %arg5: memref<8x4xbf16, #tpu.memory_space<vmem>>, %arg6: memref<8x1xf32, #tpu.memory_space<vmem>>, %arg7: memref<8x1xf32, #tpu.memory_space<vmem>>, %arg8: memref<1x1xf32, #tpu.memory_space<vmem>>, %arg9: memref<1x4x256xf32, #tpu.memory_space<vmem>>) attributes {dimension_semantics = [#tpu.dimension_semantics<parallel>, #tpu.dimension_semantics<parallel>], iteration_bounds = array<i64: 2, 1>, scalar_prefetch = 0 : i64, scratch_operands = 0 : i64, tpu.core_type = #tpu.core_type<tc>, window_params = [{transform_indices = @transform_0, window_bounds = array<i64: 1, 4, 256>}, {transform_indices = @transform_1, window_bounds = array<i64: 1, 4, 256>}, {pipeline_mode = #tpu.pipeline_mode<synchronous>, transform_indices = @transform_2, window_bounds = array<i64: 8, 4>}, {pipeline_mode = #tpu.pipeline_mode<synchronous>, transform_indices = @transform_3, window_bounds = array<i64: 8, 4>}, {pipeline_mode = #tpu.pipeline_mode<synchronous>, transform_indices = @transform_4, window_bounds = array<i64: 8, 1>}, {pipeline_mode = #tpu.pipeline_mode<synchronous>, transform_indices = @transform_5, window_bounds = array<i64: 8, 1>}, {pipeline_mode = #tpu.pipeline_mode<synchronous>, transform_indices = @transform_6, window_bounds = array<i64: 1, 1>}, {transform_indices = @transform_7, window_bounds = array<i64: 1, 4, 256>}]} {
    %c0 = arith.constant 0 : index
    %c0_0 = arith.constant 0 : index
    %0 = vector.load %arg4[%c0, %c0_0] : memref<8x4xbf16, #tpu.memory_space<vmem>>, vector<8x4xbf16>
    %c0_1 = arith.constant 0 : index
    %c0_2 = arith.constant 0 : index
    %c0_3 = arith.constant 0 : index
    %1 = vector.load %arg2[%c0_1, %c0_2, %c0_3] : memref<1x4x256xbf16, #tpu.memory_space<vmem>>, vector<1x4x256xbf16>
    %2 = vector.shape_cast %1 : vector<1x4x256xbf16> to vector<4x256xbf16>
    %cst = arith.constant dense<0.000000e+00> : vector<8x256xf32>
    %3 = tpu.matmul %0, %2, %cst {dimension_numbers = #tpu.dot_dimension_numbers<[1], [0], [0], [1], [0, 0, 1, 1], [], []>} : vector<8x4xbf16>, vector<4x256xbf16>, vector<8x256xf32> -> vector<8x256xf32>
    %c0_4 = arith.constant 0 : index
    %c0_5 = arith.constant 0 : index
    %4 = vector.load %arg5[%c0_4, %c0_5] : memref<8x4xbf16, #tpu.memory_space<vmem>>, vector<8x4xbf16>
    %c0_6 = arith.constant 0 : index
    %c0_7 = arith.constant 0 : index
    %c0_8 = arith.constant 0 : index
    %5 = vector.load %arg3[%c0_6, %c0_7, %c0_8] : memref<1x4x256xbf16, #tpu.memory_space<vmem>>, vector<1x4x256xbf16>
    %6 = vector.shape_cast %5 : vector<1x4x256xbf16> to vector<4x256xbf16>
    %cst_9 = arith.constant dense<0.000000e+00> : vector<8x256xf32>
    %7 = tpu.matmul %4, %6, %cst_9 {dimension_numbers = #tpu.dot_dimension_numbers<[1], [0], [0], [1], [0, 0, 1, 1], [], []>} : vector<8x4xbf16>, vector<4x256xbf16>, vector<8x256xf32> -> vector<8x256xf32>
    %8 = arith.addf %3, %7 : vector<8x256xf32>
    %c0_10 = arith.constant 0 : index
    %c0_11 = arith.constant 0 : index
    %9 = vector.load %arg6[%c0_10, %c0_11] : memref<8x1xf32, #tpu.memory_space<vmem>>, vector<8x1xf32>
    %10 = vector.broadcast %9 : vector<8x1xf32> to vector<8x256xf32>
    %11 = arith.addf %8, %10 : vector<8x256xf32>
    %cst_12 = arith.constant 0.000000e+00 : f32
    %12 = vector.broadcast %cst_12 : f32 to vector<8x256xf32>
    %13 = arith.maximumf %11, %12 : vector<8x256xf32>
    %c0_13 = arith.constant 0 : index
    %c0_14 = arith.constant 0 : index
    %14 = vector.load %arg7[%c0_13, %c0_14] : memref<8x1xf32, #tpu.memory_space<vmem>>, vector<8x1xf32>
    %15 = vector.broadcast %14 : vector<8x1xf32> to vector<8x256xf32>
    %16 = arith.mulf %13, %15 : vector<8x256xf32>
    %cst_15 = arith.constant dense<0.000000e+00> : vector<256xf32>
    %17 = vector.multi_reduction <add>, %16, %cst_15 [0] : vector<8x256xf32> to vector<256xf32>
    %18 = vector.shape_cast %17 : vector<256xf32> to vector<1x256xf32>
    %c0_16 = arith.constant 0 : index
    %c0_17 = arith.constant 0 : index
    %19 = vector.load %arg8[%c0_16, %c0_17] : memref<1x1xf32, #tpu.memory_space<vmem>>, vector<1x1xf32>
    %20 = vector.broadcast %19 : vector<1x1xf32> to vector<1x256xf32>
    %21 = arith.addf %18, %20 : vector<1x256xf32>
    %cst_18 = arith.constant 0.000000e+00 : f32
    %22 = vector.broadcast %cst_18 : f32 to vector<1x256xf32>
    %23 = arith.subf %22, %21 : vector<1x256xf32>
    %24 = math.exp %23 : vector<1x256xf32>
    %cst_19 = arith.constant 1.000000e+00 : f32
    %25 = vector.broadcast %cst_19 : f32 to vector<1x256xf32>
    %26 = arith.addf %25, %24 : vector<1x256xf32>
    %27 = tpu.reciprocal %26 {approx = true} : vector<1x256xf32> -> vector<1x256xf32>
    %c0_20 = arith.constant 0 : index
    %c0_21 = arith.constant 0 : index
    %c0_22 = arith.constant 0 : index
    %28 = vector.load %arg3[%c0_20, %c0_21, %c0_22] : memref<1x4x256xbf16, #tpu.memory_space<vmem>>, vector<1x4x256xbf16>
    %29 = vector.shape_cast %28 : vector<1x4x256xbf16> to vector<4x256xbf16>
    %30 = arith.extf %29 : vector<4x256xbf16> to vector<4x256xf32>
    %31 = vector.broadcast %27 : vector<1x256xf32> to vector<4x256xf32>
    %32 = arith.mulf %30, %31 : vector<4x256xf32>
    %c0_23 = arith.constant 0 : index
    %c0_24 = arith.constant 0 : index
    %c0_25 = arith.constant 0 : index
    %33 = vector.load %arg9[%c0_23, %c0_24, %c0_25] : memref<1x4x256xf32, #tpu.memory_space<vmem>>, vector<1x4x256xf32>
    %34 = vector.shape_cast %33 : vector<1x4x256xf32> to vector<4x256xf32>
    %35 = vector.shape_cast %32 : vector<4x256xf32> to vector<1x4x256xf32>
    tpu.vector_store %arg9[%c0_23, %c0_24, %c0_25], %35 {strides = array<i32>} : memref<1x4x256xf32, #tpu.memory_space<vmem>>, vector<1x4x256xf32>,
    return
  }
  func.func @transform_0(%arg0: i32, %arg1: i32) -> (i32, i32, i32) {
    %c0_i32 = arith.constant 0 : i32
    %c0_i32_0 = arith.constant 0 : i32
    return %arg0, %c0_i32, %arg1 : i32, i32, i32
  }
  func.func @transform_1(%arg0: i32, %arg1: i32) -> (i32, i32, i32) {
    %c0_i32 = arith.constant 0 : i32
    %c0_i32_0 = arith.constant 0 : i32
    return %arg0, %c0_i32, %arg1 : i32, i32, i32
  }
  func.func @transform_2(%arg0: i32, %arg1: i32) -> (i32, i32) {
    %c0_i32 = arith.constant 0 : i32
    %c0_i32_0 = arith.constant 0 : i32
    %c0_i32_1 = arith.constant 0 : i32
    return %c0_i32, %c0_i32_0 : i32, i32
  }
  func.func @transform_3(%arg0: i32, %arg1: i32) -> (i32, i32) {
    %c0_i32 = arith.constant 0 : i32
    %c0_i32_0 = arith.constant 0 : i32
    %c0_i32_1 = arith.constant 0 : i32
    return %c0_i32, %c0_i32_0 : i32, i32
  }
  func.func @transform_4(%arg0: i32, %arg1: i32) -> (i32, i32) {
    %c0_i32 = arith.constant 0 : i32
    %c0_i32_0 = arith.constant 0 : i32
    %c0_i32_1 = arith.constant 0 : i32
    return %c0_i32, %c0_i32_0 : i32, i32
  }
  func.func @transform_5(%arg0: i32, %arg1: i32) -> (i32, i32) {
    %c0_i32 = arith.constant 0 : i32
    %c0_i32_0 = arith.constant 0 : i32
    %c0_i32_1 = arith.constant 0 : i32
    return %c0_i32, %c0_i32_0 : i32, i32
  }
  func.func @transform_6(%arg0: i32, %arg1: i32) -> (i32, i32) {
    %c0_i32 = arith.constant 0 : i32
    %c0_i32_0 = arith.constant 0 : i32
    %c0_i32_1 = arith.constant 0 : i32
    return %c0_i32, %c0_i32_0 : i32, i32
  }
  func.func @transform_7(%arg0: i32, %arg1: i32) -> (i32, i32, i32) {
    %c0_i32 = arith.constant 0 : i32
    %c0_i32_0 = arith.constant 0 : i32
    return %arg0, %c0_i32, %arg1 : i32, i32, i32
  }
}

</mosaic_0001>

<bundles_post_ra>
// kernel: attention_gate_forward.1
= control target key start
LH: loop header
LB: loop body
LE: loop exit
PB: predicated region body
PF: predicated region fallthrough
CT: control target
= control target key end

     0   :  { %s723_s26 = smov 0   ;;  %s725_s27 = smov 0   ;;  %s783_s0 = inlined_call_operand.vmem [shape: bf16[2,4,256], index: 0, kind: input, shape index: {}]   ;;  %s784_s1 = inlined_call_operand.vmem [shape: bf16[2,4,256], index: 1, kind: input, shape index: {}]   ;;  %s785_s2 = inlined_call_operand.vmem [shape: bf16[8,4], index: 2, kind: input, shape index: {}]   ;;  %s786_s3 = inlined_call_operand.vmem [shape: bf16[8,4], index: 3, kind: input, shape index: {}]   ;;  %s787_s4 = inlined_call_operand.vmem [shape: f32[8,1], index: 4, kind: input, shape index: {}]   ;;  %s788_s5 = inlined_call_operand.vmem [shape: f32[8,1], index: 5, kind: input, shape index: {}]   ;;  %s789_s6 = inlined_call_operand.<no memory space> [shape: f32[1,1], index: 6, kind: input, shape index: {}]   ;;  %s790_s7 = inlined_call_operand.vmem [shape: f32[2,4,256], index: 7, kind: output, shape index: {}]  }
   0x1   :  { %v12_v0 = vstv %s789_s6  ;;  %s727_s28 = smov 0  }
   0x2   :  { %13 = vst [vmem:[#allocation2] sm:$0x1] %v12_v0 }
   0x3 LB: > { %s31_s6 = sadd.s32 1, %s673_s27  ;;  %p604_p0 = scmp.ge.s32.totalorder %s677_s28, 1  ;;  %s677_s28 = sphi %s727_s28, %s19_s28   ;;  %s673_s27 = sphi %s725_s27, %s792_s27   ;;  %s669_s26 = sphi %s723_s26, %s791_s26  }
   0x4   : > { %p33_p1 = scmp.ge.s32.totalorder %s31_s6, 2  ;;  %p277_p2 = scmp.lt.s32.totalorder %s677_s28, 3 }
   0x6   : > { %s794_s6 = smov (%p33_p1, %s31_s6), 0  ;;  %p278_p3 = pnand %p604_p0, %p277_p2 }
   0x7   : > { %p327_p4 = scmp.lt.s32.totalorder (!%p278_p3), %s669_s26, 1 }
   0x8   : > { %281 = sbr.rel (%p278_p3) target bundleno = 218 (0xda), region = 48 }
   0xd   : > { %v679_v1 = vmov 0   ;;  %v437_v2 = vld [vmem:[%s787_s4] sm:$0xff]  ;;  %s796_s26 = smov (!%p327_p4, %s669_s26), 1  ;;  %v467_v3 = vld [vmem:[#allocation2] sm:$0x1]  ;;  %vm369_vm0 = vcmask 1041408  }
   0xe   : > { %645 = vset.pattern.permute.xlu0 %v679_v1  ;;  %646 = vset.pattern.permute.xlu1 %v679_v1  ;;  %s617_s8 = sshll.u32 %s796_s26, 2  ;;  %v447_v5 = vld [vmem:[%s788_s5] sm:$0xff]  ;;  %vm365_vm1 = vcmask 31744   ;;  %vm490_vm2 = vcmask 1043456   ;;  %s619_s21 = sshll.u32 %s796_s26, 3 }
   0xf   : > { %440 = vperm.xlu0 %645, %v437_v2   ;;  %470 = vperm.xlu1 %646, %v467_v3   ;;  %s344_s11 = scalar_lea.vmem %s784_s1, %s617_s8  ;;  %s334_s16 = scalar_lea.vmem %s783_s0, %s617_s8  ;;  %v359_v11 = vld [vmem:[%s786_s3] sm:$0xf] }
  0x10   : > { %v750_v4 = vld [vmem:[%s344_s11] sm:$0xf]  ;;  %s354_s24 = scalar_lea.vmem %s790_s7, %s619_s21 }
  0x11   : > { %362 = vst [vmem:[#allocation1] ss:$4 sm:$0xff] %v750_v4  ;;  %v358_v6 = vld [vmem:[%s334_s16] sm:$0xf]  ;;  %v486_v60 = vunpack.c.l.bf16 %v750_v4 }
  0x12   : > { %v357_v16 = vld [vmem:[%s785_s2] sm:$0xf] }
  0x17   : > { %450 = vperm.xlu0 %645, %v447_v5  }
  0x18   : > { %v364_v7 = vld.sshfl [vmem:[#allocation1 + $0x8] sm:$0xff pattern:$0x73625140]  ;;  %v363_v8 = vld.sshfl [vmem:[#allocation1] sm:$0xff pattern:$0x73625140] }
  0x19   : > { %v372_v9 = vsel %vm369_vm0, %v364_v7, 0  ;;  %v370_v10 = vsel %vm369_vm0, %v363_v8, 0  ;;  %401 = vst [vmem:[#allocation1] ss:$4 sm:$0xff] %v358_v6 }
  0x1a   : > { %394 = vmatpush.bf16.msra.mxu1 %v372_v9  ;;  %381 = vmatpush.bf16.msra.mxu0 %v370_v10 }
  0x1d   : > { %612 = vmatmul.msk.bf16.vlgmr.msra.gmra.mxu1 %vm365_vm1, %v359_v11  ;;  %611 = vmatmul.msk.bf16.vlgmr.msra.gmra.mxu0 %vm365_vm1, %v359_v11 }
  0x20   : > { %v402_v12 = vld.sshfl [vmem:[#allocation1] sm:$0xff pattern:$0x73625140]  ;;  %v403_v13 = vld.sshfl [vmem:[#allocation1 + $0x8] sm:$0xff pattern:$0x73625140] }
  0x21   : > { %v407_v14 = vsel %vm369_vm0, %v402_v12, 0  ;;  %v409_v15 = vsel %vm369_vm0, %v403_v13, 0 }
  0x22   : > { %418 = vmatpush.bf16.msra.mxu2 %v407_v14  ;;  %431 = vmatpush.bf16.msra.mxu3 %v409_v15 }
  0x25   : > { %613 = vmatmul.msk.bf16.vlgmr.msra.gmra.mxu2 %vm365_vm1, %v357_v16  ;;  %614 = vmatmul.msk.bf16.vlgmr.msra.gmra.mxu3 %vm365_vm1, %v357_v16 }
  0x81   : > { %v441_v21 = vpop.permute.xlu0 %440  ;;  %v471_v41 = vpop.permute.xlu1 %470 }
  0x82   : > { %v473_v46 = vperm.slane %v471_v41, 0 }
  0x89   : > { %v451_v30 = vpop.permute.xlu0 %450 }
  0x9a   : > { %v396_v17 = vpop.f32.mrf.mxu1  ;;  %v383_v18 = vpop.f32.mrf.mxu0 }
  0xa2   : > { %v398_v19 = vpop.f32.mrf.mxu1  ;;  %v385_v20 = vpop.f32.mrf.mxu0 }
  0xa8   : > { %v420_v22 = vpop.f32.mrf.mxu2  ;;  %v433_v23 = vpop.f32.mrf.mxu3 }
  0xa9   : > { %v421_v24 = vadd.f32 %v420_v22, %v383_v18  ;;  %v434_v25 = vadd.f32 %v433_v23, %v396_v17 }
  0xab   : > { %v443_v26 = vadd.f32 %v441_v21, %v421_v24  ;;  %v444_v27 = vadd.f32 %v441_v21, %v434_v25 }
  0xad   : > { %v445_v28 = vmax.f32 %v443_v26, 0.0  ;;  %v446_v29 = vmax.f32 %v444_v27, 0.0 }
  0xaf   : > { %v453_v31 = vmul.f32 %v451_v30, %v445_v28  ;;  %v454_v32 = vmul.f32 %v451_v30, %v446_v29 }
  0xb0   : > { %v422_v33 = vpop.f32.mrf.mxu2  ;;  %v435_v34 = vpop.f32.mrf.mxu3 }
  0xb1   : > { %v455_v35 = vrot.slane %v453_v31, 4  ;;  %v461_v36 = vrot.slane %v454_v32, 4 }
  0xb3   : > { %v456_v37 = vadd.f32 %v455_v35, %v453_v31  ;;  %v462_v38 = vadd.f32 %v461_v36, %v454_v32 }
  0xb5   : > { %v457_v39 = vrot.slane %v456_v37, 2  ;;  %v463_v40 = vrot.slane %v462_v38, 2 }
  0xb7   : > { %v458_v42 = vadd.f32 %v457_v39, %v456_v37  ;;  %v464_v43 = vadd.f32 %v463_v40, %v462_v38 }
  0xb9   : > { %v459_v44 = vrot.slane %v458_v42, 1  ;;  %v465_v45 = vrot.slane %v464_v43, 1 }
  0xbb   : > { %v460_v47 = vadd.f32 %v459_v44, %v458_v42  ;;  %v466_v48 = vadd.f32 %v465_v45, %v464_v43 }
  0xbd   : > { %v474_v49 = vadd.f32 %v473_v46, %v460_v47  ;;  %v475_v50 = vadd.f32 %v473_v46, %v466_v48 }
  0xbf   : > { %v476_v51 = vsub.f32 0.0, %v474_v49  ;;  %v477_v52 = vsub.f32 0.0, %v475_v50 }
  0xc1   : > { %v478_v53 = vmul.f32 1.442695, %v476_v51  ;;  %v480_v54 = vmul.f32 1.442695, %v477_v52 }
  0xc3   : > { %647 = vpow2.f32 %v478_v53 }
  0xc4   : > { %649 = vpow2.f32 %v480_v54 }
  0xc9   : > { %v648_v55 = vpop.eup %647 }
  0xca   : > { %v650_v56 = vpop.eup %649  ;;  %v482_v57 = vadd.f32 1.0, %v648_v55 }
  0xcb   : > { %v483_v58 = vadd.f32 1.0, %v650_v56 }
  0xcd   : > { %651 = vrcp.f32 %v483_v58 }
  0xce   : > { %653 = vrcp.f32 %v482_v57 }
  0xd3   : > { %v652_v59 = vpop.eup %651 }
  0xd4   : > { %v489_v61 = vrot.slane %v652_v59, 4  ;;  %v654_v62 = vpop.eup %653 }
  0xd6   : > { %v491_v63 = vsel %vm490_vm2, %v654_v62, %v489_v61 }
  0xd7   : > { %v493_v0 = vmul.f32 %v491_v63, %v486_v60 }
  0xd9   : > { %494 = vst [vmem:[%s354_s24] sm:$0xff] %v493_v0 }
  0xda PF: > { %s19_s28 = sadd.s32 1, %s677_s28   ;;  %s791_s26 = smov %s673_s27 }
  0xdb   : > { %p16_p5 = scmp.ge.s32.totalorder %s19_s28, 4   ;;  %s792_s27 = smov %s794_s6 }
  0xdd   :  { %18 = sbr.rel (!%p16_p5) target bundleno = 3 (0x3), region = 81 }

</bundles_post_ra>
